<compile_context>
chip_gen: v7x
topology: tpu7x:2x2x1
jax: 0.10.0
libtpu: 0.0.40
codegen_flags: <defaults>
</compile_context>

<pallas_src>
import math

import jax
import jax.numpy as jnp
from jax.experimental import pallas as pl
from jax.experimental.pallas import tpu as pltpu


# ---------------------------------------------------------------------------
# pe buffer (matches the torch module's register_buffer("pe", ...))
# ---------------------------------------------------------------------------
def make_pe_buffer(d_model, max_len=5000, dtype=jnp.float32):
    """Sinusoidal positional-encoding buffer, shape (max_len, 1, d_model).

    Pass dtype=x.dtype (e.g. bf16) to halve pe-side HBM traffic for
    low-precision activations; keep float32 to match the torch buffer exactly.
    """
    position = jnp.arange(max_len, dtype=jnp.float32)[:, None]              # (max_len, 1)
    div_term = jnp.exp(
        jnp.arange(0, d_model, 2, dtype=jnp.float32) * (-math.log(10000.0) / d_model)
    )                                                                        # (ceil(D/2),)
    ang = position * div_term                                                # (max_len, ceil(D/2))
    pe = jnp.zeros((max_len, d_model), dtype=jnp.float32)
    pe = pe.at[:, 0::2].set(jnp.sin(ang))
    pe = pe.at[:, 1::2].set(jnp.cos(ang[:, : d_model // 2]))
    return pe[:, None, :].astype(dtype)                                      # (max_len, 1, D)


# ---------------------------------------------------------------------------
# kernels
# ---------------------------------------------------------------------------
def _pe_add_kernel(x_ref, pe_ref, o_ref):
    # x_ref: (bs, bb, D), pe_ref: (bs, 1, D) -> broadcast add over batch.
    o_ref[...] = (x_ref[...] + pe_ref[...]).astype(o_ref.dtype)


def _make_folded_kernel(batch, d_model):
    # x_ref / o_ref: (bs, batch*d_model) lane-dense tiles; pe_ref: (bs, d_model).
    # pe is applied per batch column-slice (static unroll) -> no concat/tile,
    # no widened pe in HBM; the output tile / DMA stays lane-dense.
    def kernel(x_ref, pe_ref, o_ref):
        pe = pe_ref[...]
        for b in range(batch):
            cols = slice(b * d_model, (b + 1) * d_model)
            o_ref[:, cols] = (x_ref[:, cols] + pe).astype(o_ref.dtype)

    return kernel


# ---------------------------------------------------------------------------
# tile sizing
# ---------------------------------------------------------------------------
_MIN_S_STEPS = 4               # keep >= this many S-steps (megacore / pipelining) ...
_MIN_STEP_STREAM_BYTES = 2 << 20   # ... but only if each step still streams this much


def _tpu_budgets():
    """(total resident VMEM budget for all double-buffered tiles, vmem_limit_bytes)."""
    kind = ""
    try:
        kind = jax.devices()[0].device_kind.lower()
    except Exception:
        pass
    if "v7" in kind:
        # v7x: only 64 MiB physical VMEM per TC -> leave headroom below that;
        # 3.2 TB/s HBM wants ~8-12 MiB x tiles.
        return 40 << 20, 56 << 20
    if "v6" in kind:
        # v6e: 128 MiB physical, 32 MiB scoped default -> raise the limit.
        return 40 << 20, 64 << 20
    if "v5" in kind and ("lite" in kind or "5e" in kind):
        # v5e: 16 MiB scoped default (128 MiB physical) -> raise limit, modest tiles.
        return 24 << 20, 64 << 20
    # Unknown generation: conservative but still above the smallest scoped default.
    return 24 << 20, 48 << 20


def _sublane_pack(itemsize):
    """Sublane packing unit: 8 for 4-byte, 16 for 2-byte, 32 for 1-byte dtypes."""
    return max(8, 32 // max(1, int(itemsize)))


def _even_split(n, blk):
    """Smallest block giving the same number of steps as `blk` (less ragged tail)."""
    return pl.cdiv(n, pl.cdiv(n, max(1, blk)))


def _cap_for_grid_steps(S, bs, per_bs_stream_bytes):
    capped = pl.cdiv(S, _MIN_S_STEPS)
    if capped < bs and capped * per_bs_stream_bytes >= _MIN_STEP_STREAM_BYTES:
        return capped
    return bs


def _choose_blocks_3d(S, B, D, x_it, o_it, pe_it, budget):
    """Pick (bs, bb) with resident VMEM = 2*bs*bb*D*(x+o) + 2*bs*D*pe <= budget."""
    per_bs_full_b = 2 * B * D * (x_it + o_it) + 2 * D * pe_it
    if per_bs_full_b <= budget:
        bs = min(S, max(1, budget // per_bs_full_b))
        bs = _cap_for_grid_steps(S, bs, B * D * (x_it + o_it))
        bs = _even_split(S, bs)
        return bs, B
    # A single full-batch row exceeds the budget: sub-tile the batch axis.
    pack = max(_sublane_pack(x_it), _sublane_pack(o_it))
    bb = min(B, max(1, budget // (2 * D * (x_it + o_it))))
    if bb < B:
        if B >= pack:
            bb = min(B, max(pack, (bb // pack) * pack))  # full-B or multiple of packing
        else:
            bb = B
    return 1, bb


def _choose_block_s_2d(S, BD, D, x_it, o_it, pe_it, budget):
    """Folded path: resident VMEM = 2*bs*BD*(x+o) + 2*bs*D*pe <= budget."""
    per_bs = 2 * BD * (x_it + o_it) + 2 * D * pe_it
    bs = min(S, max(1, budget // per_bs))
    bs = _cap_for_grid_steps(S, bs, BD * (x_it + o_it))
    bs = _even_split(S, bs)
    if bs < S:
        # bs is the second-to-last block dim here -> full-S or multiple of packing.
        pack = max(_sublane_pack(x_it), _sublane_pack(o_it), _sublane_pack(pe_it))
        bs = min(S, max(pack, (bs // pack) * pack))
    return bs


# ---------------------------------------------------------------------------
# forward
# ---------------------------------------------------------------------------
def positional_encoding(
    x,
    pe,
    *,
    out_dtype=None,
    block_s=None,
    block_b=None,
    vmem_budget_bytes=None,
    vmem_limit_bytes=None,
    fold_batch=None,
    donate_x=False,
):
    """Forward pass: x + pe[:x.shape[0]].  x: (S, B, D), pe: (max_len, 1, D)."""
    S, B, D = x.shape
    max_len = pe.shape[0]
    assert S <= max_len, f"seq_len {S} exceeds max_len {max_len}"
    assert pe.shape == (max_len, 1, D)

    # Keep the activation dtype by default (torch-style f32 promotion only on request).
    out_dtype = jnp.dtype(x.dtype if out_dtype is None else out_dtype)

    budget_default, limit_default = _tpu_budgets()
    budget = budget_default if vmem_budget_bytes is None else vmem_budget_bytes
    limit = limit_default if vmem_limit_bytes is None else vmem_limit_bytes

    x_it = jnp.dtype(x.dtype).itemsize
    o_it = out_dtype.itemsize
    pe_it = jnp.dtype(pe.dtype).itemsize

    cost = pl.CostEstimate(
        flops=S * B * D,
        transcendentals=0,
        bytes_accessed=S * B * D * (x_it + o_it) + S * D * pe_it,
    )

    extra = {}
    if donate_x and out_dtype == jnp.dtype(x.dtype):
        extra["input_output_aliases"] = {0: 0}

    if fold_batch is None:
        # Fold batch into lanes only when D is not lane-aligned (gate on small,
        # bounded B so the static per-batch unroll stays reasonable).
        fold_batch = (D % 128 != 0) and (1 < B <= 256)

    if fold_batch:
        # ---- lane-folded path: x viewed as (S, B*D) -> lane-dense DMAs & stores.
        BD = B * D
        x2 = x.reshape(S, BD)
        pe2 = pe[:S].reshape(S, D)  # tiny copy; lets bs == S satisfy block rules

        bs = _choose_block_s_2d(S, BD, D, x_it, o_it, pe_it, budget)
        if block_s is not None:
            bs = min(block_s, S)
        grid = (pl.cdiv(S, bs),)

        out2 = pl.pallas_call(
            _make_folded_kernel(B, D),
            out_shape=jax.ShapeDtypeStruct((S, BD), out_dtype),
            grid=grid,
            in_specs=[
                pl.BlockSpec((bs, BD), lambda i: (i, 0)),
                pl.BlockSpec((bs, D), lambda i: (i, 0)),
            ],
            out_specs=pl.BlockSpec((bs, BD), lambda i: (i, 0)),
            compiler_params=pltpu.CompilerParams(
                dimension_semantics=("parallel",),
                vmem_limit_bytes=limit,
            ),
            cost_estimate=cost,
            **extra,
        )(x2, pe2)
        return out2.reshape(S, B, D)

    # ---- standard 3-D path: grid over (S, B); pe tile resident across the B axis.
    bs, bb = _choose_blocks_3d(S, B, D, x_it, o_it, pe_it, budget)
    if block_s is not None:
        bs = min(block_s, S)
    if block_b is not None:
        bb = min(block_b, B)

    grid = (pl.cdiv(S, bs), pl.cdiv(B, bb))

    return pl.pallas_call(
        _pe_add_kernel,
        out_shape=jax.ShapeDtypeStruct((S, B, D), out_dtype),
        grid=grid,
        in_specs=[
            pl.BlockSpec((bs, bb, D), lambda i, j: (i, j, 0)),
            # Full pe buffer; block index depends only on i, so the tile is not
            # re-fetched across the inner B grid axis.
            pl.BlockSpec((bs, 1, D), lambda i, j: (i, 0, 0)),
        ],
        out_specs=pl.BlockSpec((bs, bb, D), lambda i, j: (i, j, 0)),
        compiler_params=pltpu.CompilerParams(
            dimension_semantics=("parallel", "parallel"),
            vmem_limit_bytes=limit,
        ),
        cost_estimate=cost,
        **extra,
    )(x, pe)


if __name__ == "__main__":
    key = jax.random.PRNGKey(0)
    k1, k2 = jax.random.split(key)

    # Case 1: module-scale shapes (seq=8, batch=2, d_model=32) -> lane-folded path.
    S, B, D = 8, 2, 32
    max_len = 64
    x = jax.random.normal(k1, (S, B, D), dtype=jnp.float32)
    pe = make_pe_buffer(D, max_len=max_len, dtype=jnp.float32)
    out = jax.block_until_ready(positional_encoding(x, pe))
    ref = x + pe[:S]
    assert out.shape == ref.shape and out.dtype == ref.dtype
    assert jnp.allclose(out, ref, atol=1e-6), "folded-path mismatch vs reference"

    # Case 2: lane-aligned width (D % 128 == 0) -> standard tiled 3-D path.
    S2, B2, D2 = 16, 8, 128
    x_b = jax.random.normal(k2, (S2, B2, D2), dtype=jnp.float32)
    pe_b = make_pe_buffer(D2, max_len=32, dtype=jnp.float32)
    out_b = jax.block_until_ready(positional_encoding(x_b, pe_b))
    ref_b = x_b + pe_b[:S2]
    assert out_b.shape == ref_b.shape and out_b.dtype == ref_b.dtype
    assert jnp.allclose(out_b, ref_b, atol=1e-6), "3-D-path mismatch vs reference"

    print("KERNEL_OK")
</pallas_src>

<mosaic_0001>
module attributes {stable_mosaic.version = 11 : i64} {
  func.func @kernel(%arg0: i32, %arg1: memref<8x64xf32, #tpu.memory_space<vmem>>, %arg2: memref<8x32xf32, #tpu.memory_space<vmem>>, %arg3: memref<8x64xf32, #tpu.memory_space<vmem>>) attributes {dimension_semantics = [#tpu.dimension_semantics<parallel>], iteration_bounds = array<i64: 1>, scalar_prefetch = 0 : i64, scratch_operands = 0 : i64, tpu.core_type = #tpu.core_type<tc>, window_params = [{transform_indices = @transform_0, window_bounds = array<i64: 8, 64>}, {transform_indices = @transform_1, window_bounds = array<i64: 8, 32>}, {transform_indices = @transform_2, window_bounds = array<i64: 8, 64>}]} {
    %c0 = arith.constant 0 : index
    %c0_0 = arith.constant 0 : index
    %0 = vector.load %arg2[%c0, %c0_0] : memref<8x32xf32, #tpu.memory_space<vmem>>, vector<8x32xf32>
    %c0_1 = arith.constant 0 : index
    %c0_2 = arith.constant 0 : index
    %1 = vector.load %arg1[%c0_1, %c0_2] : memref<8x64xf32, #tpu.memory_space<vmem>>, vector<8x32xf32>
    %2 = arith.addf %1, %0 : vector<8x32xf32>
    %c0_3 = arith.constant 0 : index
    %c0_4 = arith.constant 0 : index
    %3 = vector.load %arg3[%c0_3, %c0_4] : memref<8x64xf32, #tpu.memory_space<vmem>>, vector<8x32xf32>
    tpu.vector_store %arg3[%c0_3, %c0_4], %2 {strides = array<i32>} : memref<8x64xf32, #tpu.memory_space<vmem>>, vector<8x32xf32>,
    %c0_5 = arith.constant 0 : index
    %c32 = arith.constant 32 : index
    %4 = vector.load %arg1[%c0_5, %c32] : memref<8x64xf32, #tpu.memory_space<vmem>>, vector<8x32xf32>
    %5 = arith.addf %4, %0 : vector<8x32xf32>
    %c0_6 = arith.constant 0 : index
    %c32_7 = arith.constant 32 : index
    %6 = vector.load %arg3[%c0_6, %c32_7] : memref<8x64xf32, #tpu.memory_space<vmem>>, vector<8x32xf32>
    tpu.vector_store %arg3[%c0_6, %c32_7], %5 {strides = array<i32>} : memref<8x64xf32, #tpu.memory_space<vmem>>, vector<8x32xf32>,
    return
  }
  func.func @transform_0(%arg0: i32) -> (i32, i32) {
    %c0_i32 = arith.constant 0 : i32
    %c0_i32_0 = arith.constant 0 : i32
    return %arg0, %c0_i32 : i32, i32
  }
  func.func @transform_1(%arg0: i32) -> (i32, i32) {
    %c0_i32 = arith.constant 0 : i32
    %c0_i32_0 = arith.constant 0 : i32
    return %arg0, %c0_i32 : i32, i32
  }
  func.func @transform_2(%arg0: i32) -> (i32, i32) {
    %c0_i32 = arith.constant 0 : i32
    %c0_i32_0 = arith.constant 0 : i32
    return %arg0, %c0_i32 : i32, i32
  }
}

</mosaic_0001>

<bundles_post_ra>
// kernel: tpu_custom_call.1
= control target key start
LH: loop header
LB: loop body
LE: loop exit
PB: predicated region body
PF: predicated region fallthrough
CT: control target
= control target key end

     0   :  { %7 = vsyncpa [#allocation3], 0  ;;  %s196_s0 = inlined_call_operand.hbm [shape: f32[8,64], index: 0, kind: input, shape index: {}]   ;;  %s197_s1 = inlined_call_operand.hbm [shape: f32[8,32], index: 1, kind: input, shape index: {}]   ;;  %s198_s2 = inlined_call_operand.hbm [shape: f32[8,64], index: 2, kind: output, shape index: {}]  }
   0x1   :  { %8 = vsyncpa [#allocation6], 0 }
   0x2   :  { %9 = vsyncpa [#allocation4], 0  ;;  %s141_s9 = smov [#allocation2]   ;;  %s142_s11 = smov [#allocation5]  }
   0x3   :  { %s16_s10 = sshll.u32 %s141_s9, 4  ;;  %s26_s12 = sshll.u32 %s142_s11, 4  ;;  %s17_s10 = int_to_ptr.vmem [resolvable:$true] %s16_s10  ;;  %s27_s12 = int_to_ptr.vmem [resolvable:$true] %s26_s12 }
   0x4   :  { %s69_s15 = scalar_lea.hbm %s196_s0, 128 }
   0x5   :  { %p70_p0 = scmp.ne.s32.totalorder %s196_s0, %s69_s15  ;;  %p73_p1 = scmp.lt.u32.totalorder %s69_s15, %s196_s0 }
   0x7   :  { %p75_p2 = pnand %p73_p1, %p70_p0 }
   0x9   :  { %78 = shalt.err (!%p75_p2)
}
   0xa   :  { %s79_s20 = scalar_lea.vmem %s17_s10, 128  ;;  %p84_p4 = scmp.lt.s32.totalorder %s17_s10, %s17_s10 }
   0xb   :  { %p80_p3 = scmp.ne.s32.totalorder %s17_s10, %s79_s20  ;;  %p85_p5 = scmp.lt.s32.totalorder %s79_s20, %s79_s20 }
   0xd   :  { %p86_p6 = por %p85_p5, %p84_p4 }
   0xf   :  { %p87_p7 = pnand %p86_p6, %p80_p3 }
  0x11   :  { %90 = shalt.err (!%p87_p7)
}
  0x12   :  { %19 = dma.hbm_to_vmem [thread:$0]  %s196_s0, 128, %s17_s10, [#allocation3]  }
  0x13   :  { %s91_s25 = scalar_lea.hbm %s197_s1, 128 }
  0x14   :  { %p92_p8 = scmp.ne.s32.totalorder %s197_s1, %s91_s25  ;;  %p95_p9 = scmp.lt.u32.totalorder %s91_s25, %s197_s1 }
  0x16   :  { %p97_p10 = pnand %p95_p9, %p92_p8 }
  0x18   :  { %100 = shalt.err (!%p97_p10)
}
  0x19   :  { %s101_s30 = scalar_lea.vmem %s27_s12, 128  ;;  %p106_p12 = scmp.lt.s32.totalorder %s27_s12, %s27_s12 }
  0x1a   :  { %p102_p11 = scmp.ne.s32.totalorder %s27_s12, %s101_s30  ;;  %p107_p13 = scmp.lt.s32.totalorder %s101_s30, %s101_s30 }
  0x1c   :  { %p108_p0 = por %p107_p13, %p106_p12 }
  0x1e   :  { %p109_p1 = pnand %p108_p0, %p102_p11 }
  0x20   :  { %112 = shalt.err (!%p109_p1)
}
  0x21   :  { %29 = dma.hbm_to_vmem [thread:$0]  %s197_s1, 128, %s27_s12, [#allocation6]  }
  0x22   :  { %135 = dma.done.wait [#allocation3], 128  }
  0x23   :  { %136 = vsyncadd [#allocation3], 4294967168 }
  0x24   :  { %137 = dma.done.wait [#allocation6], 128  }
  0x25   :  { %138 = vsyncadd [#allocation6], 4294967168  ;;  %v36_v0 = vld [vmem:[#allocation5] sm:$0xff]  ;;  %v37_v1 = vld [vmem:[#allocation2] sm:$0xff]  ;;  %vm39_vm0 = vcmask 261120   ;;  %s143_s4 = smov 32  }
  0x26   :  { %v38_v2 = vadd.f32 %v37_v1, %v36_v0  ;;  %43 = vrot.lane.b32.xlu0 %v36_v0, %s143_s4  ;;  %s144_s5 = smov [#allocation7]   ;;  %vm47_vm1 = vcmask 523520  }
  0x27   :  { %s55_s6 = sshll.u32 %s144_s5, 4  ;;  %s56_s6 = int_to_ptr.vmem [resolvable:$true] %s55_s6 }
  0x28   :  { %40 = vst.msk [vmem:[#allocation7] sm:$0xff] %vm39_vm0, %v38_v2  ;;  %s113_s7 = scalar_lea.vmem %s56_s6, 128  ;;  %p118_p3 = scmp.lt.s32.totalorder %s56_s6, %s56_s6 }
  0x29   :  { %p114_p2 = scmp.ne.s32.totalorder %s56_s6, %s113_s7  ;;  %p119_p4 = scmp.lt.s32.totalorder %s113_s7, %s113_s7 }
  0x2b   :  { %p120_p5 = por %p119_p4, %p118_p3 }
  0x2d   :  { %p121_p6 = pnand %p120_p5, %p114_p2 }
  0x98   :  { %v44_v3 = vpop.permute.xlu0 %43 }
  0x99   :  { %v46_v4 = vadd.f32 %v44_v3, %v37_v1 }
  0x9b   :  { %48 = vst.msk [vmem:[#allocation7] sm:$0xff] %vm47_vm1, %v46_v4 }
  0x9c   :  { %124 = shalt.err (!%p121_p6)
}
  0x9d   :  { %s125_s9 = scalar_lea.hbm %s198_s2, 128 }
  0x9e   :  { %p126_p7 = scmp.ne.s32.totalorder %s198_s2, %s125_s9  ;;  %p129_p8 = scmp.lt.u32.totalorder %s125_s9, %s198_s2 }
  0xa0   :  { %p131_p9 = pnand %p129_p8, %p126_p7 }
  0xa2   :  { %134 = shalt.err (!%p131_p9)
}
  0xa3   :  { %58 = dma.vmem_to_hbm [thread:$0]  %s56_s6, 128, %s198_s2, [#allocation4]  }
  0xa4   :  { %139 = dma.done.wait [#allocation4], 128  }
  0xa5   :  { %140 = vsyncadd [#allocation4], 4294967168 }
  0xa6   :  { %62 = vsyncpa [#allocation3], 1 }
  0xa7   :  { %63 = vsyncpa [#allocation6], 1 }
  0xa8   :  { %64 = vsyncpa [#allocation4], 1 }

</bundles_post_ra>
